<compile_context>
chip_gen: v6e
topology: v6e:2x2x1
jax: 0.10.0
libtpu: 0.0.40
codegen_flags: <defaults>
</compile_context>

<pallas_src>
import functools

import jax
import jax.numpy as jnp
from jax import lax
from jax.experimental import pallas as pl
from jax.experimental.pallas import tpu as pltpu

LN_EPS = 1e-5


def _round_up(x, m):
    return (x + m - 1) // m * m


def _layernorm(h, gamma, beta):
    mean = jnp.mean(h, axis=-1, keepdims=True)
    var = jnp.mean((h - mean) ** 2, axis=-1, keepdims=True)
    return (h - mean) * lax.rsqrt(var + LN_EPS) * gamma + beta


def prob_edge_kernel(x_ref, wbuf_ref, vecs_ref, out_ref, *, dims, w_offs, n_edges):
    dim_in, dim_h1, dim_lh, dim_l, dim_out = dims
    o1, o2, o3, o4 = w_offs
    dim_x = dim_in + dim_l
    f32 = jnp.float32

    # Packed f32 bias / LayerNorm vectors: one [8, Fmax] array, one row per vector.
    b1 = vecs_ref[0:1, :dim_h1]
    g1 = vecs_ref[1:2, :dim_h1]
    be1 = vecs_ref[2:3, :dim_h1]
    b2 = vecs_ref[3:4, :dim_lh]
    g2 = vecs_ref[4:5, :dim_lh]
    be2 = vecs_ref[5:6, :dim_lh]
    bmv = vecs_ref[6:7, :2 * dim_l]
    bw = vecs_ref[7:8, :dim_out]

    # ONE wide input slab: [ src | dest | edge_attr | u[batch] | eps ].
    x = x_ref[...]                                  # [tile, dim_in + dim_l], compute dtype
    eps = x[:, dim_in:].astype(f32)                 # reparameterization noise lanes

    # Layer 1: single dot against w1 padded with zero rows for the eps lanes.
    w1 = wbuf_ref[:dim_x, o1:o1 + dim_h1]
    h = jnp.dot(x, w1, preferred_element_type=f32) + b1
    h = jnp.maximum(_layernorm(h, g1, be1), 0.0)

    # Layer 2.
    w2 = wbuf_ref[:dim_h1, o2:o2 + dim_lh]
    h = jnp.dot(h.astype(w2.dtype), w2, preferred_element_type=f32) + b2
    h = jnp.maximum(_layernorm(h, g2, be2), 0.0)

    # Fused mu|logvar heads: one [dim_lh, 2*dim_l] matmul.
    wmv = wbuf_ref[:dim_lh, o3:o3 + 2 * dim_l]
    zmv = jnp.dot(h.astype(wmv.dtype), wmv, preferred_element_type=f32) + bmv
    z_mu = zmv[:, :dim_l]
    z_logvar = zmv[:, dim_l:]

    # Reparameterize (f32 elementwise; exp goes to the EUP).
    z = z_mu + eps * jnp.exp(0.5 * z_logvar)

    ww = wbuf_ref[:dim_l, o4:o4 + dim_out]
    out = jnp.dot(z.astype(ww.dtype), ww, preferred_element_type=f32) + bw

    # Single fused lane-contiguous store: [ out | mu | logvar ].
    packed = jnp.concatenate([out, zmv], axis=-1)

    if n_edges is not None:
        # Zero the padded tail rows so the packed buffer is NaN/reduction safe.
        tile = packed.shape[0]
        rows = pl.program_id(0) * tile + lax.broadcasted_iota(jnp.int32, (tile, 1), 0)
        packed = jnp.where(rows < n_edges, packed, 0.0)

    out_ref[...] = packed.astype(out_ref.dtype)


@functools.partial(
    jax.jit,
    static_argnames=("tile_e", "matmul_dtype", "out_dtype", "return_packed"))
def prob_edge_forward(src, dest, edge_attr, u, batch, eps, params,
                      tile_e=4096, matmul_dtype=jnp.bfloat16,
                      out_dtype=jnp.float32, return_packed=False):
    """Returns (out [E, e_outc], z_mu [E, dim_l], z_logvar [E, dim_l]).

    With return_packed=True, returns the packed [E, e_outc + 2*dim_l] buffer laid out
    as [ out | z_mu | z_logvar ] (avoids the extra HBM pass of the three slices).
    """
    if u.ndim == 1:
        u = u[None, :]
    cdt = matmul_dtype

    # Plain-JAX glue: per-edge gather of graph-level features.
    ug = u[batch]

    E, n_inc = src.shape
    e_inc = edge_attr.shape[1]
    u_inc = ug.shape[1]
    dim_in = 2 * n_inc + e_inc + u_inc
    dim_h1 = params["w1"].shape[1]
    dim_lh = params["w2"].shape[1]
    dim_l = params["wm"].shape[1]
    dim_out = params["ww"].shape[1]
    dim_x = dim_in + dim_l
    dim_pack = dim_out + 2 * dim_l

    # Edge tile: multiple of 32 rows (bf16 packs 2 rows/sublane -> (16,128) native tile),
    # large enough to amortize the ~0.35us per-grid-step overhead, clamped so large E
    # still gets >= ~8 grid steps (4+ per TensorCore on v7x megacore).
    ROW = 32
    tile = int(min(tile_e, max(ROW, _round_up(pl.cdiv(E, 8), ROW))))
    pE = _round_up(E, tile)
    grid = (pE // tile,)

    # ONE wide input slab [E, dim_in + dim_l]; the concat fuses with this pad.
    x = jnp.concatenate([src, dest, edge_attr, ug, eps], axis=1).astype(cdt)
    x = jnp.pad(x, ((0, pE - E), (0, 0)))

    # All weights in one buffer; column blocks lane-aligned to 128 so every in-kernel
    # slice starts on a vreg boundary.  w1 gets zero rows for the eps lanes.
    w1_pad = jnp.concatenate(
        [params["w1"], jnp.zeros((dim_l, dim_h1), params["w1"].dtype)], axis=0)
    wmv = jnp.concatenate([params["wm"], params["wv"]], axis=1)
    blocks = [w1_pad, params["w2"], wmv, params["ww"]]
    LANE = 128
    rmax = _round_up(max(b.shape[0] for b in blocks), 8)
    colw = [_round_up(b.shape[1], LANE) for b in blocks]
    w_offs = tuple(int(sum(colw[:i])) for i in range(len(blocks)))
    wbuf = jnp.concatenate(
        [jnp.pad(b, ((0, rmax - b.shape[0]), (0, cw - b.shape[1])))
         for b, cw in zip(blocks, colw)], axis=1).astype(cdt)

    # Ten bias / LayerNorm vectors packed into one f32 [8, Fmax] array (one DMA).
    fmax = max(dim_h1, dim_lh, 2 * dim_l, dim_out)

    def row(v):
        v = v.reshape(1, -1).astype(jnp.float32)
        return jnp.pad(v, ((0, 0), (0, fmax - v.shape[1])))

    vecs = jnp.concatenate(
        [row(params["b1"]), row(params["g1"]), row(params["be1"]),
         row(params["b2"]), row(params["g2"]), row(params["be2"]),
         row(jnp.concatenate([params["bm"].reshape(1, -1),
                              params["bv"].reshape(1, -1)], axis=1)),
         row(params["bw"])],
        axis=0,
    )

    # Advisory cost hint + explicit VMEM budget (32 MiB floor covers v5e's 16 MiB
    # default scoped VMEM; fits v7x's 64 MiB physical at the default tile of 4096).
    flops = 2 * pE * (dim_x * dim_h1 + dim_h1 * dim_lh
                      + dim_lh * 2 * dim_l + dim_l * dim_out)
    bytes_accessed = (int(x.size) * jnp.dtype(cdt).itemsize
                      + int(wbuf.size) * jnp.dtype(cdt).itemsize
                      + int(vecs.size) * 4
                      + pE * dim_pack * jnp.dtype(out_dtype).itemsize)
    est_vmem = (2 * tile * LANE * (jnp.dtype(cdt).itemsize
                                   + jnp.dtype(out_dtype).itemsize)
                + 8 * tile * LANE * 4)
    vmem_limit = int(min(max(est_vmem, 32 * 1024 * 1024), 110 * 1024 * 1024))

    kernel = functools.partial(
        prob_edge_kernel,
        dims=(dim_in, dim_h1, dim_lh, dim_l, dim_out),
        w_offs=w_offs,
        n_edges=(E if pE != E else None),
    )

    packed = pl.pallas_call(
        kernel,
        out_shape=jax.ShapeDtypeStruct((pE, dim_pack), out_dtype),
        grid=grid,
        in_specs=[
            pl.BlockSpec((tile, dim_x), lambda i: (i, 0)),
            pl.BlockSpec(wbuf.shape, lambda i: (0, 0)),
            pl.BlockSpec(vecs.shape, lambda i: (0, 0)),
        ],
        out_specs=pl.BlockSpec((tile, dim_pack), lambda i: (i, 0)),
        compiler_params=pltpu.CompilerParams(
            dimension_semantics=("parallel",),
            vmem_limit_bytes=vmem_limit,
        ),
        cost_estimate=pl.CostEstimate(
            flops=int(flops),
            transcendentals=int(pE * dim_l),
            bytes_accessed=int(bytes_accessed)),
    )(x, wbuf, vecs)

    if return_packed:
        return packed[:E] if pE != E else packed

    out = packed[:E, :dim_out]
    z_mu = packed[:E, dim_out:dim_out + dim_l]
    z_logvar = packed[:E, dim_out + dim_l:]
    return out, z_mu, z_logvar


def init_params(key, dim_in, dim_h1, dim_lh, dim_l, dim_out):
    ks = jax.random.split(key, 5)

    def lin(k, fan_in, fan_out):
        bound = 1.0 / jnp.sqrt(fan_in)
        kw, kb = jax.random.split(k)
        w = jax.random.uniform(kw, (fan_in, fan_out), jnp.float32, -bound, bound)
        b = jax.random.uniform(kb, (1, fan_out), jnp.float32, -bound, bound)
        return w, b

    p = {}
    p["w1"], p["b1"] = lin(ks[0], dim_in, dim_h1)
    p["g1"], p["be1"] = jnp.ones((1, dim_h1), jnp.float32), jnp.zeros((1, dim_h1), jnp.float32)
    p["w2"], p["b2"] = lin(ks[1], dim_h1, dim_lh)
    p["g2"], p["be2"] = jnp.ones((1, dim_lh), jnp.float32), jnp.zeros((1, dim_lh), jnp.float32)
    p["wm"], p["bm"] = lin(ks[2], dim_lh, dim_l)
    p["wv"], p["bv"] = lin(ks[3], dim_lh, dim_l)
    p["ww"], p["bw"] = lin(ks[4], dim_l, dim_out)
    return p


def reference_forward(src, dest, edge_attr, u, batch, eps, params):
    """Pure-JAX reference of the PyTorch forward (same reparameterize noise)."""
    if u.ndim == 1:
        u = u[None, :]
    x = jnp.concatenate([src, dest, edge_attr, u[batch]], axis=1)

    def ln(h, g, b):
        m = jnp.mean(h, -1, keepdims=True)
        v = jnp.mean((h - m) ** 2, -1, keepdims=True)
        return (h - m) / jnp.sqrt(v + LN_EPS) * g + b

    h = jnp.maximum(ln(x @ params["w1"] + params["b1"], params["g1"], params["be1"]), 0.0)
    h = jnp.maximum(ln(h @ params["w2"] + params["b2"], params["g2"], params["be2"]), 0.0)
    z_mu = h @ params["wm"] + params["bm"]
    z_var = h @ params["wv"] + params["bv"]
    z = z_mu + eps * jnp.exp(0.5 * z_var)
    out = z @ params["ww"] + params["bw"]
    return out, z_mu, z_var


if __name__ == "__main__":
    # config: e_inc=4, n_inc=4, u_inc=4 -> dim_in = 4 + 2*4 + 4 = 16,
    # edge_model_mlp1_hidden_sizes=[32, 32], latent dim 16, e_outc=8.
    n_inc = e_inc = u_inc = 4
    dim_in = e_inc + 2 * n_inc + u_inc
    dim_h1, dim_lh, dim_l, dim_out = 32, 32, 16, 8

    key = jax.random.PRNGKey(0)
    k_p, key = jax.random.split(key)
    params = init_params(k_p, dim_in, dim_h1, dim_lh, dim_l, dim_out)

    def make_inputs(k, E, B):
        ks = jax.random.split(k, 5)
        src = jax.random.normal(ks[0], (E, n_inc), jnp.float32)
        dest = jax.random.normal(ks[1], (E, n_inc), jnp.float32)
        edge_attr = jax.random.normal(ks[2], (E, e_inc), jnp.float32)
        u = jax.random.normal(ks[3], (B, u_inc), jnp.float32)
        batch = jnp.repeat(jnp.arange(B, dtype=jnp.int32), E // B)
        eps = jax.random.normal(ks[4], (E, dim_l), jnp.float32)
        return src, dest, edge_attr, u, batch, eps

    # winding ([E, 2]) is accepted by the PyTorch forward signature but unused; omitted.
    k1, k2, key = jax.random.split(key, 3)

    # f32 path (exact vs reference).
    args64 = make_inputs(k1, 64, 2)
    out, z_mu, z_var = prob_edge_forward(*args64, params, matmul_dtype=jnp.float32)
    jax.block_until_ready((out, z_mu, z_var))
    r_out, r_mu, r_var = reference_forward(*args64, params)
    assert out.shape == (64, dim_out) and z_mu.shape == (64, dim_l) and z_var.shape == (64, dim_l)
    assert jnp.allclose(out, r_out, atol=2e-4, rtol=2e-4)
    assert jnp.allclose(z_mu, r_mu, atol=2e-4, rtol=2e-4)
    assert jnp.allclose(z_var, r_var, atol=2e-4, rtol=2e-4)

    # Ragged E (exercises the padded, row-masked tail tile).
    args50 = make_inputs(k2, 50, 2)
    out2, mu2, var2 = prob_edge_forward(*args50, params, matmul_dtype=jnp.float32)
    jax.block_until_ready(out2)
    r_out2, r_mu2, r_var2 = reference_forward(*args50, params)
    assert out2.shape == (50, dim_out)
    assert jnp.allclose(out2, r_out2, atol=2e-4, rtol=2e-4)
    assert jnp.allclose(mu2, r_mu2, atol=2e-4, rtol=2e-4)
    assert jnp.allclose(var2, r_var2, atol=2e-4, rtol=2e-4)

    # Default bf16 MXU-operand path; LN / exp / reparam stay f32 (eps rounded to bf16).
    out_b, mu_b, var_b = prob_edge_forward(*args64, params)
    jax.block_until_ready(out_b)
    assert jnp.all(jnp.isfinite(out_b)) and jnp.all(jnp.isfinite(mu_b)) and jnp.all(jnp.isfinite(var_b))
    assert jnp.allclose(out_b, r_out, atol=0.25, rtol=0.25)

    # Packed-output path (no post-kernel slicing).
    packed = prob_edge_forward(*args64, params, return_packed=True)
    jax.block_until_ready(packed)
    assert packed.shape == (64, dim_out + 2 * dim_l)

    print("KERNEL_OK")
</pallas_src>

<mosaic_0001>
module attributes {stable_mosaic.version = 11 : i64} {
  func.func @prob_edge_kernel(%arg0: i32, %arg1: memref<32x32xf32, #tpu.memory_space<vmem>>, %arg2: memref<32x512xf32, #tpu.memory_space<vmem>>, %arg3: memref<8x32xf32, #tpu.memory_space<vmem>>, %arg4: memref<32x40xf32, #tpu.memory_space<vmem>>) attributes {dimension_semantics = [#tpu.dimension_semantics<parallel>], iteration_bounds = array<i64: 2>, scalar_prefetch = 0 : i64, scratch_operands = 0 : i64, tpu.core_type = #tpu.core_type<tc>, window_params = [{transform_indices = @transform_0, window_bounds = array<i64: 32, 32>}, {pipeline_mode = #tpu.pipeline_mode<synchronous>, transform_indices = @transform_1, window_bounds = array<i64: 32, 512>}, {pipeline_mode = #tpu.pipeline_mode<synchronous>, transform_indices = @transform_2, window_bounds = array<i64: 8, 32>}, {transform_indices = @transform_3, window_bounds = array<i64: 32, 40>}]} {
    %c0 = arith.constant 0 : index
    %c0_0 = arith.constant 0 : index
    %0 = vector.load %arg3[%c0, %c0_0] : memref<8x32xf32, #tpu.memory_space<vmem>>, vector<1x32xf32>
    %c1 = arith.constant 1 : index
    %c0_1 = arith.constant 0 : index
    %1 = vector.load %arg3[%c1, %c0_1] : memref<8x32xf32, #tpu.memory_space<vmem>>, vector<1x32xf32>
    %c2 = arith.constant 2 : index
    %c0_2 = arith.constant 0 : index
    %2 = vector.load %arg3[%c2, %c0_2] : memref<8x32xf32, #tpu.memory_space<vmem>>, vector<1x32xf32>
    %c3 = arith.constant 3 : index
    %c0_3 = arith.constant 0 : index
    %3 = vector.load %arg3[%c3, %c0_3] : memref<8x32xf32, #tpu.memory_space<vmem>>, vector<1x32xf32>
    %c4 = arith.constant 4 : index
    %c0_4 = arith.constant 0 : index
    %4 = vector.load %arg3[%c4, %c0_4] : memref<8x32xf32, #tpu.memory_space<vmem>>, vector<1x32xf32>
    %c5 = arith.constant 5 : index
    %c0_5 = arith.constant 0 : index
    %5 = vector.load %arg3[%c5, %c0_5] : memref<8x32xf32, #tpu.memory_space<vmem>>, vector<1x32xf32>
    %c6 = arith.constant 6 : index
    %c0_6 = arith.constant 0 : index
    %6 = vector.load %arg3[%c6, %c0_6] : memref<8x32xf32, #tpu.memory_space<vmem>>, vector<1x32xf32>
    %c7 = arith.constant 7 : index
    %c0_7 = arith.constant 0 : index
    %7 = vector.load %arg3[%c7, %c0_7] : memref<8x32xf32, #tpu.memory_space<vmem>>, vector<1x8xf32>
    %c0_8 = arith.constant 0 : index
    %c0_9 = arith.constant 0 : index
    %8 = vector.load %arg1[%c0_8, %c0_9] : memref<32x32xf32, #tpu.memory_space<vmem>>, vector<32x32xf32>
    %9 = vector.extract_strided_slice %8 {offsets = [0, 16], sizes = [32, 16], strides = [1, 1]} : vector<32x32xf32> to vector<32x16xf32>
    %c0_10 = arith.constant 0 : index
    %c0_11 = arith.constant 0 : index
    %10 = vector.load %arg2[%c0_10, %c0_11] : memref<32x512xf32, #tpu.memory_space<vmem>>, vector<32x32xf32>
    %cst = arith.constant dense<0.000000e+00> : vector<32x32xf32>
    %11 = tpu.matmul %8, %10, %cst {dimension_numbers = #tpu.dot_dimension_numbers<[1], [0], [0], [1], [0, 0, 1, 1], [], []>} : vector<32x32xf32>, vector<32x32xf32>, vector<32x32xf32> -> vector<32x32xf32>
    %12 = vector.broadcast %0 : vector<1x32xf32> to vector<32x32xf32>
    %13 = arith.addf %11, %12 : vector<32x32xf32>
    %cst_12 = arith.constant dense<0.000000e+00> : vector<32xf32>
    %14 = vector.multi_reduction <add>, %13, %cst_12 [1] : vector<32x32xf32> to vector<32xf32>
    %15 = vector.shape_cast %14 : vector<32xf32> to vector<32x1xf32>
    %cst_13 = arith.constant 3.200000e+01 : f32
    %16 = vector.broadcast %cst_13 : f32 to vector<32x1xf32>
    %17 = arith.divf %15, %16 : vector<32x1xf32>
    %18 = vector.broadcast %17 : vector<32x1xf32> to vector<32x32xf32>
    %19 = arith.subf %13, %18 : vector<32x32xf32>
    %20 = arith.mulf %19, %19 : vector<32x32xf32>
    %cst_14 = arith.constant dense<0.000000e+00> : vector<32xf32>
    %21 = vector.multi_reduction <add>, %20, %cst_14 [1] : vector<32x32xf32> to vector<32xf32>
    %22 = vector.shape_cast %21 : vector<32xf32> to vector<32x1xf32>
    %cst_15 = arith.constant 3.200000e+01 : f32
    %23 = vector.broadcast %cst_15 : f32 to vector<32x1xf32>
    %24 = arith.divf %22, %23 : vector<32x1xf32>
    %25 = vector.broadcast %17 : vector<32x1xf32> to vector<32x32xf32>
    %26 = arith.subf %13, %25 : vector<32x32xf32>
    %cst_16 = arith.constant 9.99999974E-6 : f32
    %27 = vector.broadcast %cst_16 : f32 to vector<32x1xf32>
    %28 = arith.addf %24, %27 : vector<32x1xf32>
    %29 = math.rsqrt %28 : vector<32x1xf32>
    %30 = vector.broadcast %29 : vector<32x1xf32> to vector<32x32xf32>
    %31 = arith.mulf %26, %30 : vector<32x32xf32>
    %32 = vector.broadcast %1 : vector<1x32xf32> to vector<32x32xf32>
    %33 = arith.mulf %31, %32 : vector<32x32xf32>
    %34 = vector.broadcast %2 : vector<1x32xf32> to vector<32x32xf32>
    %35 = arith.addf %33, %34 : vector<32x32xf32>
    %cst_17 = arith.constant 0.000000e+00 : f32
    %36 = vector.broadcast %cst_17 : f32 to vector<32x32xf32>
    %37 = arith.maximumf %35, %36 : vector<32x32xf32>
    %c0_18 = arith.constant 0 : index
    %c128 = arith.constant 128 : index
    %38 = vector.load %arg2[%c0_18, %c128] : memref<32x512xf32, #tpu.memory_space<vmem>>, vector<32x32xf32>
    %cst_19 = arith.constant dense<0.000000e+00> : vector<32x32xf32>
    %39 = tpu.matmul %37, %38, %cst_19 {dimension_numbers = #tpu.dot_dimension_numbers<[1], [0], [0], [1], [0, 0, 1, 1], [], []>} : vector<32x32xf32>, vector<32x32xf32>, vector<32x32xf32> -> vector<32x32xf32>
    %40 = vector.broadcast %3 : vector<1x32xf32> to vector<32x32xf32>
    %41 = arith.addf %39, %40 : vector<32x32xf32>
    %cst_20 = arith.constant dense<0.000000e+00> : vector<32xf32>
    %42 = vector.multi_reduction <add>, %41, %cst_20 [1] : vector<32x32xf32> to vector<32xf32>
    %43 = vector.shape_cast %42 : vector<32xf32> to vector<32x1xf32>
    %cst_21 = arith.constant 3.200000e+01 : f32
    %44 = vector.broadcast %cst_21 : f32 to vector<32x1xf32>
    %45 = arith.divf %43, %44 : vector<32x1xf32>
    %46 = vector.broadcast %45 : vector<32x1xf32> to vector<32x32xf32>
    %47 = arith.subf %41, %46 : vector<32x32xf32>
    %48 = arith.mulf %47, %47 : vector<32x32xf32>
    %cst_22 = arith.constant dense<0.000000e+00> : vector<32xf32>
    %49 = vector.multi_reduction <add>, %48, %cst_22 [1] : vector<32x32xf32> to vector<32xf32>
    %50 = vector.shape_cast %49 : vector<32xf32> to vector<32x1xf32>
    %cst_23 = arith.constant 3.200000e+01 : f32
    %51 = vector.broadcast %cst_23 : f32 to vector<32x1xf32>
    %52 = arith.divf %50, %51 : vector<32x1xf32>
    %53 = vector.broadcast %45 : vector<32x1xf32> to vector<32x32xf32>
    %54 = arith.subf %41, %53 : vector<32x32xf32>
    %cst_24 = arith.constant 9.99999974E-6 : f32
    %55 = vector.broadcast %cst_24 : f32 to vector<32x1xf32>
    %56 = arith.addf %52, %55 : vector<32x1xf32>
    %57 = math.rsqrt %56 : vector<32x1xf32>
    %58 = vector.broadcast %57 : vector<32x1xf32> to vector<32x32xf32>
    %59 = arith.mulf %54, %58 : vector<32x32xf32>
    %60 = vector.broadcast %4 : vector<1x32xf32> to vector<32x32xf32>
    %61 = arith.mulf %59, %60 : vector<32x32xf32>
    %62 = vector.broadcast %5 : vector<1x32xf32> to vector<32x32xf32>
    %63 = arith.addf %61, %62 : vector<32x32xf32>
    %cst_25 = arith.constant 0.000000e+00 : f32
    %64 = vector.broadcast %cst_25 : f32 to vector<32x32xf32>
    %65 = arith.maximumf %63, %64 : vector<32x32xf32>
    %c0_26 = arith.constant 0 : index
    %c256 = arith.constant 256 : index
    %66 = vector.load %arg2[%c0_26, %c256] : memref<32x512xf32, #tpu.memory_space<vmem>>, vector<32x32xf32>
    %cst_27 = arith.constant dense<0.000000e+00> : vector<32x32xf32>
    %67 = tpu.matmul %65, %66, %cst_27 {dimension_numbers = #tpu.dot_dimension_numbers<[1], [0], [0], [1], [0, 0, 1, 1], [], []>} : vector<32x32xf32>, vector<32x32xf32>, vector<32x32xf32> -> vector<32x32xf32>
    %68 = vector.broadcast %6 : vector<1x32xf32> to vector<32x32xf32>
    %69 = arith.addf %67, %68 : vector<32x32xf32>
    %70 = vector.extract_strided_slice %69 {offsets = [0, 0], sizes = [32, 16], strides = [1, 1]} : vector<32x32xf32> to vector<32x16xf32>
    %71 = vector.extract_strided_slice %69 {offsets = [0, 16], sizes = [32, 16], strides = [1, 1]} : vector<32x32xf32> to vector<32x16xf32>
    %cst_28 = arith.constant 5.000000e-01 : f32
    %72 = vector.broadcast %cst_28 : f32 to vector<32x16xf32>
    %73 = arith.mulf %72, %71 : vector<32x16xf32>
    %74 = math.exp %73 : vector<32x16xf32>
    %75 = arith.mulf %9, %74 : vector<32x16xf32>
    %76 = arith.addf %70, %75 : vector<32x16xf32>
    %c0_29 = arith.constant 0 : index
    %c384 = arith.constant 384 : index
    %77 = vector.load %arg2[%c0_29, %c384] : memref<32x512xf32, #tpu.memory_space<vmem>>, vector<16x8xf32>
    %cst_30 = arith.constant dense<0.000000e+00> : vector<32x8xf32>
    %78 = tpu.matmul %76, %77, %cst_30 {dimension_numbers = #tpu.dot_dimension_numbers<[1], [0], [0], [1], [0, 0, 1, 1], [], []>} : vector<32x16xf32>, vector<16x8xf32>, vector<32x8xf32> -> vector<32x8xf32>
    %79 = vector.broadcast %7 : vector<1x8xf32> to vector<32x8xf32>
    %80 = arith.addf %78, %79 : vector<32x8xf32>
    %81 = tpu.concatenate %80, %69 in 1 : vector<32x8xf32>, vector<32x32xf32> -> vector<32x40xf32>
    %c0_31 = arith.constant 0 : index
    %c0_32 = arith.constant 0 : index
    %82 = vector.load %arg4[%c0_31, %c0_32] : memref<32x40xf32, #tpu.memory_space<vmem>>, vector<32x40xf32>
    tpu.vector_store %arg4[%c0_31, %c0_32], %81 {strides = array<i32>} : memref<32x40xf32, #tpu.memory_space<vmem>>, vector<32x40xf32>,
    return
  }
  func.func @transform_0(%arg0: i32) -> (i32, i32) {
    %c0_i32 = arith.constant 0 : i32
    %c0_i32_0 = arith.constant 0 : i32
    return %arg0, %c0_i32 : i32, i32
  }
  func.func @transform_1(%arg0: i32) -> (i32, i32) {
    %c0_i32 = arith.constant 0 : i32
    %c0_i32_0 = arith.constant 0 : i32
    %c0_i32_1 = arith.constant 0 : i32
    return %c0_i32, %c0_i32_0 : i32, i32
  }
  func.func @transform_2(%arg0: i32) -> (i32, i32) {
    %c0_i32 = arith.constant 0 : i32
    %c0_i32_0 = arith.constant 0 : i32
    %c0_i32_1 = arith.constant 0 : i32
    return %c0_i32, %c0_i32_0 : i32, i32
  }
  func.func @transform_3(%arg0: i32) -> (i32, i32) {
    %c0_i32 = arith.constant 0 : i32
    %c0_i32_0 = arith.constant 0 : i32
    return %arg0, %c0_i32 : i32, i32
  }
}

</mosaic_0001>

<bundles_post_ra>
// kernel: prob_edge_forward.1
= control target key start
LH: loop header
LB: loop body
LE: loop exit
PB: predicated region body
PF: predicated region fallthrough
CT: control target
= control target key end

     0   :  { %s1050_s12 = smov 0   ;;  %s1192_s0 = inlined_call_operand.vmem [shape: f32[64,32], index: 0, kind: input, shape index: {}]   ;;  %s1193_s1 = inlined_call_operand.vmem [shape: f32[32,512], index: 1, kind: input, shape index: {}]   ;;  %s1194_s2 = inlined_call_operand.vmem [shape: f32[8,32], index: 2, kind: input, shape index: {}]   ;;  %s1195_s3 = inlined_call_operand.vmem [shape: f32[64,40], index: 3, kind: output, shape index: {}]  }
   0x1 LB: > { %s869_s13 = sadd.s32 4294967295, %s1026_s12   ;;  %p873_p0 = scmp.ge.s32.totalorder %s1026_s12, 1  ;;  %s1026_s12 = sphi %s1050_s12, %s13_s12  }
   0x2   : > { %p138_p1 = scmp.lt.s32.totalorder %s1026_s12, 3 }
   0x4   : > { %p139_p2 = pnand %p873_p0, %p138_p1 }
   0x5   : > { %s874_s18 = sshll.u32 (!%p139_p2), %s869_s13, 2  ;;  %s1028_s10 = smov (!%p139_p2), 112  }
   0x6   : > { %142 = sbr.rel (%p139_p2) target bundleno = 1580 (0x62c), region = 32  ;;  %p163_p3 = scmp.lt.s32.totalorder (!%p139_p2), %s874_s18, 7 }
   0x7   : > { %s1029_s11 = smov (!%p139_p2), 8  }
   0xb   : > { %v189_v0 = vld [vmem:[%s1193_s1 + $0x60] sm:$0xff]  ;;  %s1197_s18 = smov (!%p163_p3, %s874_s18), 7  ;;  %vm194_vm0 = vcmask 261120   ;;  %v368_v41 = vld [vmem:[%s1193_s1 + $0x68] sm:$0xff]  ;;  %vm689_vm1 = vcmask 130048   ;;  %vm803_vm2 = vcmask 64512  }
   0xc   : > { %v188_v1 = vld [vmem:[%s1193_s1 + $0x40] sm:$0xff]  ;;  %934 = vmatprep.subr.mxu0 %v189_v0  ;;  %s875_s23 = sshll.u32 %s1197_s18, 3  ;;  %v367_v42 = vld [vmem:[%s1193_s1 + $0x48] sm:$0xff]  ;;  %948 = vmatprep.subr.mxu1 %v368_v41  ;;  %vm808_vm3 = vcmask 326656  }
   0xd   : > { %935 = vmatpush3.msra.mxu0 %v189_v0  ;;  %v187_v2 = vld [vmem:[%s1193_s1 + $0x20] sm:$0xff]  ;;  %s166_s26 = scalar_lea.vmem %s1192_s0, %s875_s23  ;;  %949 = vmatpush3.msra.mxu1 %v368_v41  ;;  %v366_v43 = vld [vmem:[%s1193_s1 + $0x28] sm:$0xff]  ;;  %s172_s17 = scalar_lea.vmem %s1195_s3, %s875_s23 }
   0xe   : > { %936 = vmatprep.subr.mxu0 %v188_v1  ;;  %v186_v3 = vld [vmem:[%s1193_s1] sm:$0xff]  ;;  %v1080_v5 = vld [vmem:[%s166_s26 + $0x8] sm:$0xff]  ;;  %v1082_v6 = vld [vmem:[%s166_s26 + $0x10] sm:$0xff]  ;;  %950 = vmatprep.subr.mxu1 %v367_v42 }
   0xf   : > { %937 = vmatpush3.msra.mxu0 %v188_v1  ;;  %v1078_v4 = vld [vmem:[%s166_s26] sm:$0xff]  ;;  %v1090_v7 = vld [vmem:[%s166_s26 + $0x18] sm:$0xff]  ;;  %951 = vmatpush3.msra.mxu1 %v367_v42  ;;  %v365_v44 = vld [vmem:[%s1193_s1 + $0x8] sm:$0xff] }
  0x10   : > { %938 = vmatprep.subr.mxu0 %v187_v2  ;;  %942 = vmatprep.mubr.msk.f32.mxu0 %vm194_vm0, %v1078_v4  ;;  %v878_v9 = vld [vmem:[%s1194_s2] ss:$0 sm:$0xff]  ;;  %v883_v58 = vld [vmem:[%s1194_s2 + $0x1] ss:$0 sm:$0xff]  ;;  %v884_v60 = vld [vmem:[%s1194_s2 + $0x2] ss:$0 sm:$0xff] }
  0x11   : > { %939 = vmatpush3.msra.mxu0 %v187_v2  ;;  %952 = vmatprep.subr.mxu1 %v366_v43 }
  0x12   : > { %940 = vmatprep.subr.mxu0 %v186_v3  ;;  %953 = vmatpush3.msra.mxu1 %v366_v43 }
  0x13   : > { %941 = vmatpush3.msra.mxu0 %v186_v3  ;;  %954 = vmatprep.subr.mxu1 %v365_v44 }
  0x14   : > { %943 = vmatmul.mubr.msk.f32.vlgmr.msra.gmra.mxu0 %vm194_vm0, %v1080_v5  ;;  %955 = vmatpush3.msra.mxu1 %v365_v44 }
  0x15   : > { %945 = vmatprep.mubr.msk.f32.mxu0 %vm194_vm0, %v1082_v6 }
  0x18   : > { %946 = vmatmul.mubr.msk.f32.gmra.mxu0 %vm194_vm0, %v1090_v7 }
  0xd4   : > { %v944_v8 = vpop.f32.mrf.mxu0 }
  0xd5   : > { %v279_v13 = vadd.f32 %v944_v8, %v878_v9 }
  0xd6   : > { %v273_v10 = vpop.f32.mrf.mxu0 }
  0xd7   : > { %v274_v11 = vadd.f32 %v878_v9, %v273_v10  ;;  %v295_v19 = vsel %vm194_vm0, %v279_v13, 0.0 }
  0xd8   : > { %v947_v12 = vpop.f32.mrf.mxu0 }
  0xd9   : > { %v292_v14 = vsel %vm194_vm0, %v274_v11, 0.0  ;;  %v289_v17 = vadd.f32 %v947_v12, %v878_v9 }
  0xda   : > { %v283_v15 = vpop.f32.mrf.mxu0  ;;  %293 = vadd.xlane.f32.xlu0 %v292_v14 }
  0xdb   : > { %v284_v16 = vadd.f32 %v878_v9, %v283_v15  ;;  %v301_v20 = vsel %vm194_vm0, %v289_v17, 0.0 }
  0xdd   : > { %v298_v18 = vsel %vm194_vm0, %v284_v16, 0.0 }
  0xde   : > { %299 = vadd.xlane.f32.xlu1 %v298_v18  ;;  %296 = vadd.xlane.f32.xlu0 %v295_v19  ;;  %v885_v19 = vld [vmem:[%s1194_s2 + $0x3] ss:$0 sm:$0xff] }
  0xe2   : > { %302 = vadd.xlane.f32.xlu1 %v301_v20 }
 0x163   : > { %v294_v21 = vpop.xlane.xlu0 %293 }
 0x164   : > { %v305_v22 = vmul.f32 0.03125, %v294_v21 }
 0x166   : > { %v309_v23 = vsub.f32 %v274_v11, %v305_v22 }
 0x167   : > { %v300_v24 = vpop.xlane.xlu1 %299  ;;  %v297_v25 = vpop.xlane.xlu0 %296 }
 0x168   : > { %v307_v26 = vmul.f32 0.03125, %v300_v24  ;;  %v306_v27 = vmul.f32 0.03125, %v297_v25  ;;  %v313_v28 = vmul.f32 %v309_v23, %v309_v23 }
 0x16a   : > { %v311_v29 = vsub.f32 %v284_v16, %v307_v26  ;;  %v310_v30 = vsub.f32 %v279_v13, %v306_v27  ;;  %v317_v31 = vsel %vm194_vm0, %v313_v28, 0.0 }
 0x16b   : > { %v303_v32 = vpop.xlane.xlu1 %302  ;;  %318 = vadd.xlane.f32.xlu0 %v317_v31 }
 0x16c   : > { %v308_v33 = vmul.f32 0.03125, %v303_v32  ;;  %v315_v34 = vmul.f32 %v311_v29, %v311_v29  ;;  %v314_v35 = vmul.f32 %v310_v30, %v310_v30 }
 0x16e   : > { %v312_v36 = vsub.f32 %v289_v17, %v308_v33  ;;  %v323_v37 = vsel %vm194_vm0, %v315_v34, 0.0  ;;  %v320_v38 = vsel %vm194_vm0, %v314_v35, 0.0 }
 0x16f   : > { %324 = vadd.xlane.f32.xlu0 %v323_v37  ;;  %321 = vadd.xlane.f32.xlu1 %v320_v38 }
 0x170   : > { %v316_v39 = vmul.f32 %v312_v36, %v312_v36 }
 0x172   : > { %v326_v40 = vsel %vm194_vm0, %v316_v39, 0.0 }
 0x173   : > { %327 = vadd.xlane.f32.xlu1 %v326_v40 }
 0x1f4   : > { %v319_v45 = vpop.xlane.xlu0 %318 }
 0x1f5   : > { %v329_v46 = vmul.f32 0.03125, %v319_v45 }
 0x1f7   : > { %v333_v47 = vadd.f32 1e-05, %v329_v46 }
 0x1f8   : > { %v322_v48 = vpop.xlane.xlu1 %321  ;;  %v325_v49 = vpop.xlane.xlu0 %324 }
 0x1f9   : > { %996 = vrsqrt.f32 %v333_v47  ;;  %v330_v50 = vmul.f32 0.03125, %v322_v48  ;;  %v331_v51 = vmul.f32 0.03125, %v325_v49 }
 0x1fb   : > { %v334_v52 = vadd.f32 1e-05, %v330_v50  ;;  %v335_v53 = vadd.f32 1e-05, %v331_v51 }
 0x1fc   : > { %v328_v54 = vpop.xlane.xlu1 %327 }
 0x1fd   : > { %998 = vrsqrt.f32 %v334_v52  ;;  %v332_v55 = vmul.f32 0.03125, %v328_v54  ;;  %v545_v52 = vld [vmem:[%s1193_s1 + $0x70] sm:$0xff] }
 0x1fe   : > { %1000 = vrsqrt.f32 %v335_v53  ;;  %v544_v53 = vld [vmem:[%s1193_s1 + $0x50] sm:$0xff]  ;;  %962 = vmatprep.subr.mxu0 %v545_v52 }
 0x1ff   : > { %v336_v56 = vadd.f32 1e-05, %v332_v55  ;;  %963 = vmatpush3.msra.mxu0 %v545_v52  ;;  %v543_v54 = vld [vmem:[%s1193_s1 + $0x30] sm:$0xff] }
 0x200   : > { %964 = vmatprep.subr.mxu0 %v544_v53  ;;  %v542_v55 = vld [vmem:[%s1193_s1 + $0x10] sm:$0xff] }
 0x201   : > { %1002 = vrsqrt.f32 %v336_v56  ;;  %965 = vmatpush3.msra.mxu0 %v544_v53 }
 0x202   : > { %966 = vmatprep.subr.mxu0 %v543_v54 }
 0x203   : > { %967 = vmatpush3.msra.mxu0 %v543_v54 }
 0x204   : > { %968 = vmatprep.subr.mxu0 %v542_v55 }
 0x205   : > { %969 = vmatpush3.msra.mxu0 %v542_v55 }
 0x206   : > { %v997_v57 = vpop.eup %996 }
 0x207   : > { %v341_v59 = vmul.f32 %v997_v57, %v309_v23 }
 0x209   : > { %v349_v61 = vmul.f32 %v883_v58, %v341_v59 }
 0x20a   : > { %v999_v62 = vpop.eup %998 }
 0x20b   : > { %v1001_v63 = vpop.eup %1000  ;;  %v357_v0 = vadd.f32 %v884_v60, %v349_v61  ;;  %v342_v1 = vmul.f32 %v999_v62, %v310_v30 }
 0x20c   : > { %v343_v2 = vmul.f32 %v1001_v63, %v311_v29 }
 0x20d   : > { %v361_v3 = vmax.f32 %v357_v0, 0.0  ;;  %v350_v8 = vmul.f32 %v883_v58, %v342_v1 }
 0x20e   : > { %v1003_v9 = vpop.eup %1002  ;;  %v351_v10 = vmul.f32 %v883_v58, %v343_v2 }
 0x20f   : > { %956 = vmatprep.mubr.msk.f32.mxu1 %vm194_vm0, %v361_v3  ;;  %v358_v11 = vadd.f32 %v884_v60, %v350_v8  ;;  %v344_v12 = vmul.f32 %v1003_v9, %v312_v36  ;;  %v890_v9 = vld [vmem:[%s1194_s2 + $0x4] ss:$0 sm:$0xff] }
 0x210   : > { %v359_v13 = vadd.f32 %v884_v60, %v351_v10 }
 0x211   : > { %v362_v14 = vmax.f32 %v358_v11, 0.0  ;;  %v352_v15 = vmul.f32 %v883_v58, %v344_v12  ;;  %v891_v12 = vld [vmem:[%s1194_s2 + $0x5] ss:$0 sm:$0xff] }
 0x212   : > { %v363_v16 = vmax.f32 %v359_v13, 0.0 }
 0x213   : > { %957 = vmatmul.mubr.msk.f32.vlgmr.msra.gmra.mxu1 %vm194_vm0, %v362_v14  ;;  %v360_v17 = vadd.f32 %v884_v60, %v352_v15 }
 0x214   : > { %959 = vmatprep.mubr.msk.f32.mxu1 %vm194_vm0, %v363_v16 }
 0x215   : > { %v364_v18 = vmax.f32 %v360_v17, 0.0 }
 0x217   : > { %960 = vmatmul.mubr.msk.f32.gmra.mxu1 %vm194_vm0, %v364_v18 }
 0x2d3   : > { %v958_v20 = vpop.f32.mrf.mxu1 }
 0x2d4   : > { %v457_v21 = vadd.f32 %v958_v20, %v885_v19 }
 0x2d5   : > { %v451_v22 = vpop.f32.mrf.mxu1 }
 0x2d6   : > { %v452_v23 = vadd.f32 %v885_v19, %v451_v22  ;;  %v473_v24 = vsel %vm194_vm0, %v457_v21, 0.0 }
 0x2d7   : > { %474 = vadd.xlane.f32.xlu1 %v473_v24  ;;  %v961_v25 = vpop.f32.mrf.mxu1 }
 0x2d8   : > { %v467_v26 = vadd.f32 %v961_v25, %v885_v19  ;;  %v470_v27 = vsel %vm194_vm0, %v452_v23, 0.0 }
 0x2d9   : > { %471 = vadd.xlane.f32.xlu0 %v470_v27  ;;  %v461_v28 = vpop.f32.mrf.mxu1 }
 0x2da   : > { %v462_v29 = vadd.f32 %v885_v19, %v461_v28  ;;  %v479_v30 = vsel %vm194_vm0, %v467_v26, 0.0 }
 0x2db   : > { %480 = vadd.xlane.f32.xlu1 %v479_v30  ;;  %v684_v30 = vld [vmem:[%s1193_s1 + $0x38] sm:$0xff] }
 0x2dc   : > { %v476_v31 = vsel %vm194_vm0, %v462_v29, 0.0  ;;  %976 = vmatprep.subr.mxu1 %v684_v30 }
 0x2dd   : > { %477 = vadd.xlane.f32.xlu0 %v476_v31  ;;  %977 = vmatpush3.msra.mxu1 %v684_v30  ;;  %v892_v31 = vld [vmem:[%s1194_s2 + $0x6] ss:$0 sm:$0xff] }
 0x360   : > { %v475_v32 = vpop.xlane.xlu1 %474 }
 0x361   : > { %v483_v33 = vmul.f32 0.03125, %v475_v32 }
 0x362   : > { %v472_v34 = vpop.xlane.xlu0 %471 }
 0x363   : > { %v487_v35 = vsub.f32 %v457_v21, %v483_v33  ;;  %v482_v36 = vmul.f32 0.03125, %v472_v34 }
 0x364   : > { %v481_v37 = vpop.xlane.xlu1 %480 }
 0x365   : > { %v486_v38 = vsub.f32 %v452_v23, %v482_v36  ;;  %v485_v39 = vmul.f32 0.03125, %v481_v37  ;;  %v491_v40 = vmul.f32 %v487_v35, %v487_v35 }
 0x366   : > { %v478_v41 = vpop.xlane.xlu0 %477 }
 0x367   : > { %v489_v42 = vsub.f32 %v467_v26, %v485_v39  ;;  %v484_v43 = vmul.f32 0.03125, %v478_v41  ;;  %v497_v44 = vsel %vm194_vm0, %v491_v40, 0.0  ;;  %v490_v45 = vmul.f32 %v486_v38, %v486_v38 }
 0x368   : > { %498 = vadd.xlane.f32.xlu1 %v497_v44 }
 0x369   : > { %v488_v46 = vsub.f32 %v462_v29, %v484_v43  ;;  %v494_v47 = vsel %vm194_vm0, %v490_v45, 0.0  ;;  %v493_v48 = vmul.f32 %v489_v42, %v489_v42 }
 0x36a   : > { %495 = vadd.xlane.f32.xlu0 %v494_v47 }
 0x36b   : > { %v503_v49 = vsel %vm194_vm0, %v493_v48, 0.0  ;;  %v492_v50 = vmul.f32 %v488_v46, %v488_v46  ;;  %v683_v48 = vld [vmem:[%s1193_s1 + $0x18] sm:$0xff] }
 0x36c   : > { %504 = vadd.xlane.f32.xlu1 %v503_v49  ;;  %978 = vmatprep.subr.mxu1 %v683_v48 }
 0x36d   : > { %v500_v51 = vsel %vm194_vm0, %v492_v50, 0.0  ;;  %979 = vmatpush3.msra.mxu1 %v683_v48 }
 0x36e   : > { %501 = vadd.xlane.f32.xlu0 %v500_v51 }
 0x3f1   : > { %v499_v56 = vpop.xlane.xlu1 %498 }
 0x3f2   : > { %v507_v57 = vmul.f32 0.03125, %v499_v56 }
 0x3f3   : > { %v496_v58 = vpop.xlane.xlu0 %495 }
 0x3f4   : > { %v511_v59 = vadd.f32 1e-05, %v507_v57  ;;  %v506_v60 = vmul.f32 0.03125, %v496_v58 }
 0x3f5   : > { %v505_v61 = vpop.xlane.xlu1 %504 }
 0x3f6   : > { %1004 = vrsqrt.f32 %v511_v59  ;;  %v510_v62 = vadd.f32 1e-05, %v506_v60  ;;  %v509_v63 = vmul.f32 0.03125, %v505_v61 }
 0x3f7   : > { %v502_v0 = vpop.xlane.xlu0 %501 }
 0x3f8   : > { %1006 = vrsqrt.f32 %v510_v62  ;;  %v513_v1 = vadd.f32 1e-05, %v509_v63  ;;  %v508_v2 = vmul.f32 0.03125, %v502_v0 }
 0x3fa   : > { %1008 = vrsqrt.f32 %v513_v1  ;;  %v512_v3 = vadd.f32 1e-05, %v508_v2 }
 0x3fc   : > { %1010 = vrsqrt.f32 %v512_v3 }
 0x403   : > { %v1005_v8 = vpop.eup %1004 }
 0x404   : > { %v519_v10 = vmul.f32 %v1005_v8, %v487_v35 }
 0x405   : > { %v1007_v11 = vpop.eup %1006 }
 0x406   : > { %v518_v13 = vmul.f32 %v1007_v11, %v486_v38  ;;  %v527_v14 = vmul.f32 %v890_v9, %v519_v10 }
 0x407   : > { %v1009_v15 = vpop.eup %1008 }
 0x408   : > { %v526_v16 = vmul.f32 %v890_v9, %v518_v13  ;;  %v521_v17 = vmul.f32 %v1009_v15, %v489_v42  ;;  %v535_v19 = vadd.f32 %v891_v12, %v527_v14 }
 0x409   : > { %v1011_v18 = vpop.eup %1010 }
 0x40a   : > { %v534_v20 = vadd.f32 %v891_v12, %v526_v16  ;;  %v520_v21 = vmul.f32 %v1011_v18, %v488_v46  ;;  %v529_v22 = vmul.f32 %v890_v9, %v521_v17  ;;  %v539_v25 = vmax.f32 %v535_v19, 0.0 }
 0x40c   : > { %v538_v23 = vmax.f32 %v534_v20, 0.0  ;;  %v528_v24 = vmul.f32 %v890_v9, %v520_v21  ;;  %v537_v26 = vadd.f32 %v891_v12, %v529_v22 }
 0x40e   : > { %970 = vmatprep.mubr.msk.f32.mxu0 %vm194_vm0, %v538_v23  ;;  %v536_v27 = vadd.f32 %v891_v12, %v528_v24  ;;  %v541_v29 = vmax.f32 %v537_v26, 0.0 }
 0x40f   : > { %971 = vmatmul.mubr.msk.f32.vlgmr.msra.gmra.mxu0 %vm194_vm0, %v539_v25 }
 0x410   : > { %v540_v28 = vmax.f32 %v536_v27, 0.0 }
 0x412   : > { %973 = vmatprep.mubr.msk.f32.mxu0 %vm194_vm0, %v540_v28 }
 0x413   : > { %974 = vmatmul.mubr.msk.f32.gmra.mxu0 %vm194_vm0, %v541_v29 }
 0x4cf   : > { %v972_v32 = vpop.f32.mrf.mxu0 }
 0x4d0   : > { %v634_v33 = vadd.f32 %v972_v32, %v892_v31 }
 0x4d1   : > { %v628_v34 = vpop.f32.mrf.mxu0 }
 0x4d2   : > { %v648_v35 = vmul.f32 0.5, %v634_v33  ;;  %v629_v36 = vadd.f32 %v892_v31, %v628_v34 }
 0x4d3   : > { %v975_v37 = vpop.f32.mrf.mxu0 }
 0x4d4   : > { %v653_v38 = vmul.f32 1.442695, %v648_v35  ;;  %v647_v39 = vmul.f32 0.5, %v629_v36  ;;  %v644_v40 = vadd.f32 %v975_v37, %v892_v31 }
 0x4d5   : > { %v638_v41 = vpop.f32.mrf.mxu0 }
 0x4d6   : > { %1012 = vpow2.f32 %v653_v38  ;;  %v651_v42 = vmul.f32 1.442695, %v647_v39  ;;  %v650_v43 = vmul.f32 0.5, %v644_v40  ;;  %v639_v44 = vadd.f32 %v892_v31, %v638_v41 }
 0x4d8   : > { %1014 = vpow2.f32 %v651_v42  ;;  %v649_v45 = vmul.f32 0.5, %v639_v44  ;;  %v657_v46 = vmul.f32 1.442695, %v650_v43 }
 0x4da   : > { %v655_v47 = vmul.f32 1.442695, %v649_v45 }
 0x4dc   : > { %1016 = vpow2.f32 %v655_v47 }
 0x4dd   : > { %1018 = vpow2.f32 %v657_v46 }
 0x4e3   : > { %v1013_v49 = vpop.eup %1012 }
 0x4e4   : > { %v660_v50 = vmul.f32 %v1013_v49, %v1080_v5 }
 0x4e5   : > { %v1015_v51 = vpop.eup %1014 }
 0x4e6   : > { %669 = vrot.lane.b32.xlu1 %v660_v50, %s1028_s10  ;;  %v659_v52 = vmul.f32 %v1015_v51, %v1078_v4 }
 0x4e8   : > { %667 = vrot.lane.b32.xlu0 %v659_v52, %s1028_s10 }
 0x4e9   : > { %v1017_v53 = vpop.eup %1016 }
 0x4ea   : > { %v661_v54 = vmul.f32 %v1017_v53, %v1082_v6  ;;  %v1019_v55 = vpop.eup %1018 }
 0x4eb   : > { %v662_v56 = vmul.f32 %v1019_v55, %v1090_v7  ;;  %v897_v7 = vld [vmem:[%s1194_s2 + $0x7] ss:$0 sm:$0xff] }
 0x4ec   : > { %791 = vrot.lane.b32.xlu0 %v629_v36, %s1029_s11  ;;  %671 = vrot.lane.b32.xlu1 %v661_v54, %s1028_s10 }
 0x4f0   : > { %795 = vrot.lane.b32.xlu0 %v639_v44, %s1029_s11  ;;  %673 = vrot.lane.b32.xlu1 %v662_v56, %s1028_s10 }
 0x4f4   : > { %793 = vrot.lane.b32.xlu1 %v634_v33, %s1029_s11 }
 0x4f8   : > { %797 = vrot.lane.b32.xlu1 %v644_v40, %s1029_s11 }
 0x558   : > { %v670_v5 = vpop.permute.xlu1 %669 }
 0x559   : > { %v680_v4 = vadd.f32 %v670_v5, %v634_v33 }
 0x55a   : > { %v668_v57 = vpop.permute.xlu0 %667 }
 0x55b   : > { %v679_v58 = vadd.f32 %v668_v57, %v629_v36 }
 0x55d   : > { %980 = vmatprep.mubr.msk.f32.mxu1 %vm689_vm1, %v679_v58 }
 0x55e   : > { %v672_v59 = vpop.permute.xlu1 %671  ;;  %981 = vmatmul.mubr.msk.f32.vlgmr.msra.gmra.mxu1 %vm689_vm1, %v680_v4  ;;  %v792_v2 = vpop.permute.xlu0 %791 }
 0x55f   : > { %v681_v6 = vadd.f32 %v672_v59, %v639_v44 }
 0x561   : > { %983 = vmatprep.mubr.msk.f32.mxu1 %vm689_vm1, %v681_v6 }
 0x562   : > { %v674_v60 = vpop.permute.xlu1 %673  ;;  %v796_v14 = vpop.permute.xlu0 %795 }
 0x563   : > { %v682_v61 = vadd.f32 %v674_v60, %v644_v40 }
 0x565   : > { %984 = vmatmul.mubr.msk.f32.gmra.mxu1 %vm689_vm1, %v682_v61 }
 0x566   : > { %v794_v3 = vpop.permute.xlu1 %793 }
 0x56a   : > { %v798_v15 = vpop.permute.xlu1 %797 }
 0x61e   : > { %v982_v62 = vpop.f32.mrf.mxu1 }
 0x61f   : > { %v774_v63 = vadd.f32 %v982_v62, %v897_v7 }
 0x620   : > { %v768_v0 = vpop.f32.mrf.mxu1 }
 0x621   : > { %v769_v1 = vadd.f32 %v897_v7, %v768_v0  ;;  %v805_v9 = vsel %vm803_vm2, %v774_v63, %v794_v3 }
 0x622   : > { %810 = vst.msk [vmem:[%s172_s17 + $0x8] sm:$0xff] %vm808_vm3, %v805_v9 }
 0x623   : > { %v804_v8 = vsel %vm803_vm2, %v769_v1, %v792_v2 }
 0x624   : > { %809 = vst.msk [vmem:[%s172_s17] sm:$0xff] %vm808_vm3, %v804_v8 }
 0x625   : > { %v985_v10 = vpop.f32.mrf.mxu1 }
 0x626   : > { %v784_v11 = vadd.f32 %v985_v10, %v897_v7 }
 0x627   : > { %v778_v12 = vpop.f32.mrf.mxu1 }
 0x628   : > { %v779_v13 = vadd.f32 %v897_v7, %v778_v12  ;;  %v807_v17 = vsel %vm803_vm2, %v784_v11, %v798_v15 }
 0x629   : > { %812 = vst.msk [vmem:[%s172_s17 + $0x18] sm:$0xff] %vm808_vm3, %v807_v17 }
 0x62a   : > { %v806_v16 = vsel %vm803_vm2, %v779_v13, %v796_v14 }
 0x62b   : > { %811 = vst.msk [vmem:[%s172_s17 + $0x10] sm:$0xff] %vm808_vm3, %v806_v16 }
 0x62c PF: > { %s13_s12 = sadd.s32 1, %s1026_s12  }
 0x62d   : > { %p10_p4 = scmp.ge.s32.totalorder %s13_s12, 4  }
 0x62f   :  { %12 = sbr.rel (!%p10_p4) target bundleno = 1 (0x1), region = 62 }

</bundles_post_ra>
